<compile_context>
chip_gen: v5e
topology: v5e:2x2
jax: 0.10.0
libtpu: 0.0.40
codegen_flags: <defaults>
</compile_context>

<pallas_src>
import functools

import jax
import jax.numpy as jnp
from jax.experimental import pallas as pl
from jax.experimental.pallas import tpu as pltpu


def _round_up(x, m):
    return (x + m - 1) // m * m


def _padded_row_bytes(L, D, itemsize):
    # VMEM footprint of one (1, L, D) row after (sublane, lane) tiling/padding.
    sublane = max(1, 32 // itemsize)        # 8 for f32, 16 for bf16, 32 for int8
    return _round_up(L, sublane) * _round_up(D, 128) * itemsize


def _pick_batch_tile(B, L, D, itemsize, target_bytes=12 << 20):
    """Largest batch tile whose padded VMEM footprint is <= ~target_bytes."""
    row = _padded_row_bytes(L, D, itemsize)
    return int(max(1, min(B, target_bytes // max(row, 1))))


def _contrastive_loss_kernel(hs_ref, out_ref, acc_ref, *, margin, L, B,
                             batch_tile, nb_per_core, inv_denom, use_mxu):
    c = pl.program_id(0)            # "parallel" core-split axis
    b = pl.program_id(1)            # "arbitrary" accumulation axis

    @pl.when(b == 0)
    def _init():
        acc_ref[...] = jnp.zeros_like(acc_ref)

    hs = hs_ref[...]                          # (tb, L, D), native dtype
    tgt = hs[:, L - 1:L, :]                   # (tb, 1, D): last timestep

    if use_mxu:
        # Batched MXU contraction over D with f32 multiply-accumulate:
        # scores[b, l] = <hs[b, L-1, :], hs[b, l, :]>
        scores = jnp.einsum("bkd,bld->bkl", tgt, hs,
                            preferred_element_type=jnp.float32)[:, 0, :]
    else:
        # VPU fallback for degenerate tiny-row shapes: widening fused into the
        # reduction, no materialized f32 copy of the full tile.
        scores = jnp.sum(tgt * hs, axis=2, dtype=jnp.float32)        # (tb, L)

    col = jax.lax.broadcasted_iota(jnp.int32, scores.shape, 1)       # (tb, L)
    row = jax.lax.broadcasted_iota(jnp.int32, scores.shape, 0)       # (tb, L)

    # Global batch index of each row; masks the ragged last tile and the
    # overhang grid steps of the core split (their block index is clamped in
    # the index_map, so their data must contribute zero).
    tile_idx = c * nb_per_core + b
    row_valid = (tile_idx * batch_tile + row) < B

    # d = scores[:, L-2] via a masked reduce (no sub-tile slice copies).
    d = jnp.sum(jnp.where(col == L - 2, scores, 0.0), axis=1, keepdims=True)

    # NOTE: column j = L-1 (tgt.tgt) is computed and masked out below; that is
    # harmless for f32/bf16 but would need masking-before-square for
    # narrow-exponent dtypes (fp16/fp8-class).
    cost = jnp.maximum(jnp.float32(margin) + scores - d, 0.0)        # (tb, L)
    cost = jnp.where((col < L - 2) & row_valid, cost, 0.0)

    acc_ref[...] += cost

    @pl.when(b == pl.num_programs(1) - 1)
    def _finalize():
        partial = jnp.sum(acc_ref[...]) * jnp.float32(inv_denom)
        # Lane-dense scalar broadcast; the wrapper reads [:, 0, 0].
        out_ref[...] = jnp.broadcast_to(partial, out_ref.shape)


def contrastive_loss(hs, margin=0.0, batch_tile=None, use_mxu=None):
    """hs: (B, L, D) float array (f32 or bf16).  Returns scalar float32 loss."""
    B, L, D = hs.shape
    assert L >= 3, "need >= 3 timesteps (src has L-1 cols, scores drops one more)"
    itemsize = jnp.dtype(hs.dtype).itemsize

    if batch_tile is None:
        batch_tile = _pick_batch_tile(B, L, D, itemsize)
    batch_tile = int(max(1, min(int(batch_tile), B)))

    n_tiles = pl.cdiv(B, batch_tile)
    num_splits = 2 if n_tiles > 1 else 1       # v7x: 2 TensorCores; no-op elsewhere
    nb_per_core = pl.cdiv(n_tiles, num_splits)

    if use_mxu is None:
        # The batched dot_general emits one small matmul per batch row of the
        # tile; keep it off the critical path for degenerate tiny-row shapes.
        use_mxu = batch_tile <= 256

    denom = B * (L - 2)
    kernel = functools.partial(
        _contrastive_loss_kernel, margin=float(margin), L=L, B=B,
        batch_tile=batch_tile, nb_per_core=nb_per_core,
        inv_denom=1.0 / float(denom), use_mxu=bool(use_mxu))

    tile_vmem = batch_tile * _padded_row_bytes(L, D, itemsize)
    # Double-buffered input tile + scratch + headroom; capped below v7x's
    # 64 MiB physical VMEM (v5e/v6e have 128 MiB, so the cap is safe there too).
    vmem_limit = int(min(max(32 << 20, 3 * tile_vmem + (4 << 20)), 56 << 20))

    def hs_index_map(c, b):
        # Clamp overhang grid steps to the last real tile; the kernel masks
        # their rows out via the global row index.
        return (jnp.minimum(c * nb_per_core + b, n_tiles - 1), 0, 0)

    cost_est = pl.CostEstimate(
        flops=2 * B * L * D + 8 * B * L,
        transcendentals=0,
        bytes_accessed=B * L * D * itemsize + num_splits * 8 * 128 * 4)

    out = pl.pallas_call(
        kernel,
        out_shape=jax.ShapeDtypeStruct((num_splits, 8, 128), jnp.float32),
        grid_spec=pltpu.PrefetchScalarGridSpec(
            num_scalar_prefetch=0,
            grid=(num_splits, nb_per_core),
            in_specs=[pl.BlockSpec((batch_tile, L, D), hs_index_map)],
            out_specs=pl.BlockSpec((1, 8, 128), lambda c, b: (c, 0, 0)),
            scratch_shapes=[pltpu.VMEM((batch_tile, L), jnp.float32)],
        ),
        compiler_params=pltpu.CompilerParams(
            dimension_semantics=("parallel", "arbitrary"),
            vmem_limit_bytes=vmem_limit,
        ),
        cost_estimate=cost_est,
    )(hs)

    # One partial sum per core-split; trivial combine.
    return jnp.sum(out[:, 0, 0])


def contrastive_loss_ref(hs, margin=0.0):
    hs = hs.astype(jnp.float32)
    tgt = hs[:, -1:, :]
    src = hs[:, :-1, :]
    scores = jnp.sum(tgt * src, axis=2)
    d = scores[:, -1:]
    scores = scores[:, :-1]
    cost = jnp.maximum(margin + scores - d, 0.0)
    return jnp.mean(cost)


if __name__ == "__main__":
    key = jax.random.PRNGKey(0)
    B, L, D = 2, 8, 32
    hs = jax.random.normal(key, (B, L, D), dtype=jnp.float32)

    ref = jax.block_until_ready(contrastive_loss_ref(hs, margin=0.0))

    # Default path (MXU contraction, single tile, single core-split).
    loss = jax.block_until_ready(contrastive_loss(hs, margin=0.0))
    assert jnp.allclose(loss, ref, atol=1e-5, rtol=1e-5), (loss, ref)

    # VPU fallback path.
    loss_vpu = jax.block_until_ready(contrastive_loss(hs, margin=0.0, use_mxu=False))
    assert jnp.allclose(loss_vpu, ref, atol=1e-5, rtol=1e-5), (loss_vpu, ref)

    # Multi-tile accumulation + 2-way core-split grid.
    loss_tiled = jax.block_until_ready(contrastive_loss(hs, margin=0.0, batch_tile=1))
    assert jnp.allclose(loss_tiled, ref, atol=1e-5, rtol=1e-5), (loss_tiled, ref)

    # Ragged batch (B not divisible by batch_tile) + non-zero margin.
    hs5 = jax.random.normal(jax.random.PRNGKey(1), (5, L, D), dtype=jnp.float32)
    ref5 = jax.block_until_ready(contrastive_loss_ref(hs5, margin=0.2))
    loss5 = jax.block_until_ready(contrastive_loss(hs5, margin=0.2, batch_tile=2))
    assert jnp.allclose(loss5, ref5, atol=1e-5, rtol=1e-5), (loss5, ref5)

    # bf16 input: MXU path uses f32 multiply-accumulate, so it tracks the
    # f32 reference of the bf16-cast input closely.
    hs_bf16 = hs.astype(jnp.bfloat16)
    ref_bf16 = jax.block_until_ready(contrastive_loss_ref(hs_bf16, margin=0.0))
    loss_bf16 = jax.block_until_ready(contrastive_loss(hs_bf16, margin=0.0))
    assert jnp.allclose(loss_bf16, ref_bf16, atol=1e-2, rtol=1e-2), (loss_bf16, ref_bf16)

    print("KERNEL_OK")
</pallas_src>

<mosaic_0001>
module attributes {stable_mosaic.version = 11 : i64} {
  func.func @_contrastive_loss_kernel(%arg0: i32, %arg1: i32, %arg2: memref<2x8x32xf32, #tpu.memory_space<vmem>>, %arg3: memref<1x8x128xf32, #tpu.memory_space<vmem>>, %arg4: memref<2x8xf32, #tpu.memory_space<vmem>>) attributes {dimension_semantics = [#tpu.dimension_semantics<parallel>, #tpu.dimension_semantics<arbitrary>], iteration_bounds = array<i64: 1, 1>, scalar_prefetch = 0 : i64, scratch_operands = 1 : i64, tpu.core_type = #tpu.core_type<tc>, window_params = [{transform_indices = @transform_0, window_bounds = array<i64: 2, 8, 32>}, {transform_indices = @transform_1, window_bounds = array<i64: 1, 8, 128>}]} {
    %c0_i32 = arith.constant 0 : i32
    %0 = arith.cmpi eq, %arg1, %c0_i32 : i32
    %1 = arith.extui %0 : i1 to i32
    %c0_i32_0 = arith.constant 0 : i32
    %2 = arith.cmpi ne, %1, %c0_i32_0 : i32
    scf.if %2 {
      %cst_16 = arith.constant 0.000000e+00 : f32
      %39 = vector.broadcast %cst_16 : f32 to vector<2x8xf32>
      %c0_17 = arith.constant 0 : index
      %c0_18 = arith.constant 0 : index
      %40 = vector.load %arg4[%c0_17, %c0_18] : memref<2x8xf32, #tpu.memory_space<vmem>>, vector<2x8xf32>
      tpu.vector_store %arg4[%c0_17, %c0_18], %39 {strides = array<i32>} : memref<2x8xf32, #tpu.memory_space<vmem>>, vector<2x8xf32>,
    } else {
    }
    %c0 = arith.constant 0 : index
    %c0_1 = arith.constant 0 : index
    %c0_2 = arith.constant 0 : index
    %3 = vector.load %arg2[%c0, %c0_1, %c0_2] : memref<2x8x32xf32, #tpu.memory_space<vmem>>, vector<2x8x32xf32>
    %4 = vector.extract_strided_slice %3 {offsets = [0, 7, 0], sizes = [2, 1, 32], strides = [1, 1, 1]} : vector<2x8x32xf32> to vector<2x1x32xf32>
    "tpu.trace_start"() <{level = 10 : i32, message = "bkd,bld->bkl"}> : () -> ()
    %cst = arith.constant dense<0.000000e+00> : vector<2x1x8xf32>
    %5 = tpu.matmul %4, %3, %cst {dimension_numbers = #tpu.dot_dimension_numbers<[2], [2], [1], [1], [0, 0, 0, 1, 1, 1], [0], [0]>} : vector<2x1x32xf32>, vector<2x8x32xf32>, vector<2x1x8xf32> -> vector<2x1x8xf32>
    "tpu.trace_stop"() : () -> ()
    %6 = vector.shape_cast %5 : vector<2x1x8xf32> to vector<2x8xf32>
    %7 = tpu.iota {dimensions = array<i32: 1>} : vector<2x8xi32>
    %8 = tpu.iota {dimensions = array<i32: 0>} : vector<2x8xi32>
    %c1_i32 = arith.constant 1 : i32
    %9 = arith.muli %arg0, %c1_i32 : i32
    %10 = arith.addi %9, %arg1 : i32
    %c2_i32 = arith.constant 2 : i32
    %11 = arith.muli %10, %c2_i32 : i32
    %12 = vector.broadcast %11 : i32 to vector<2x8xi32>
    %13 = arith.addi %12, %8 : vector<2x8xi32>
    %c2_i32_3 = arith.constant 2 : i32
    %14 = vector.broadcast %c2_i32_3 : i32 to vector<2x8xi32>
    %15 = arith.cmpi slt, %13, %14 : vector<2x8xi32>
    %c6_i32 = arith.constant 6 : i32
    %16 = vector.broadcast %c6_i32 : i32 to vector<2x8xi32>
    %17 = arith.cmpi eq, %7, %16 : vector<2x8xi32>
    %cst_4 = arith.constant 0.000000e+00 : f32
    %18 = vector.broadcast %cst_4 : f32 to vector<2x8xf32>
    %19 = arith.select %17, %6, %18 : vector<2x8xi1>, vector<2x8xf32>
    %cst_5 = arith.constant dense<0.000000e+00> : vector<2xf32>
    %20 = vector.multi_reduction <add>, %19, %cst_5 [1] : vector<2x8xf32> to vector<2xf32>
    %21 = vector.shape_cast %20 : vector<2xf32> to vector<2x1xf32>
    %cst_6 = arith.constant 0.000000e+00 : f32
    %22 = vector.broadcast %cst_6 : f32 to vector<2x8xf32>
    %23 = arith.addf %22, %6 : vector<2x8xf32>
    %24 = vector.broadcast %21 : vector<2x1xf32> to vector<2x8xf32>
    %25 = arith.subf %23, %24 : vector<2x8xf32>
    %cst_7 = arith.constant 0.000000e+00 : f32
    %26 = vector.broadcast %cst_7 : f32 to vector<2x8xf32>
    %27 = arith.maximumf %25, %26 : vector<2x8xf32>
    %c6_i32_8 = arith.constant 6 : i32
    %28 = vector.broadcast %c6_i32_8 : i32 to vector<2x8xi32>
    %29 = arith.cmpi slt, %7, %28 : vector<2x8xi32>
    %30 = arith.andi %29, %15 : vector<2x8xi1>
    %cst_9 = arith.constant 0.000000e+00 : f32
    %31 = vector.broadcast %cst_9 : f32 to vector<2x8xf32>
    %32 = arith.select %30, %27, %31 : vector<2x8xi1>, vector<2x8xf32>
    %c0_10 = arith.constant 0 : index
    %c0_11 = arith.constant 0 : index
    %33 = vector.load %arg4[%c0_10, %c0_11] : memref<2x8xf32, #tpu.memory_space<vmem>>, vector<2x8xf32>
    %34 = arith.addf %33, %32 : vector<2x8xf32>
    %c0_12 = arith.constant 0 : index
    %c0_13 = arith.constant 0 : index
    %35 = vector.load %arg4[%c0_12, %c0_13] : memref<2x8xf32, #tpu.memory_space<vmem>>, vector<2x8xf32>
    tpu.vector_store %arg4[%c0_12, %c0_13], %34 {strides = array<i32>} : memref<2x8xf32, #tpu.memory_space<vmem>>, vector<2x8xf32>,
    %c0_i32_14 = arith.constant 0 : i32
    %36 = arith.cmpi eq, %arg1, %c0_i32_14 : i32
    %37 = arith.extui %36 : i1 to i32
    %c0_i32_15 = arith.constant 0 : i32
    %38 = arith.cmpi ne, %37, %c0_i32_15 : i32
    scf.if %38 {
      %c0_16 = arith.constant 0 : index
      %c0_17 = arith.constant 0 : index
      %39 = vector.load %arg4[%c0_16, %c0_17] : memref<2x8xf32, #tpu.memory_space<vmem>>, vector<2x8xf32>
      %40 = vector.shape_cast %39 : vector<2x8xf32> to vector<1x2x8xf32>
      %cst_18 = arith.constant dense<0.000000e+00> : vector<1xf32>
      %41 = vector.multi_reduction <add>, %40, %cst_18 [1, 2] : vector<1x2x8xf32> to vector<1xf32>
      %42 = vector.shape_cast %41 : vector<1xf32> to vector<1x1x1xf32>
      %43 = vector.extract %42[0, 0, 0] : f32 from vector<1x1x1xf32>
      %cst_19 = arith.constant 0.0833333358 : f32
      %44 = arith.mulf %43, %cst_19 : f32
      %45 = vector.broadcast %44 : f32 to vector<1x8x128xf32>
      %c0_20 = arith.constant 0 : index
      %c0_21 = arith.constant 0 : index
      %c0_22 = arith.constant 0 : index
      %46 = vector.load %arg3[%c0_20, %c0_21, %c0_22] : memref<1x8x128xf32, #tpu.memory_space<vmem>>, vector<1x8x128xf32>
      tpu.vector_store %arg3[%c0_20, %c0_21, %c0_22], %45 {strides = array<i32>} : memref<1x8x128xf32, #tpu.memory_space<vmem>>, vector<1x8x128xf32>,
    } else {
    }
    return
  }
  func.func @transform_0(%arg0: i32, %arg1: i32) -> (i32, i32, i32) {
    %c1_i32 = arith.constant 1 : i32
    %0 = arith.muli %arg0, %c1_i32 : i32
    %1 = arith.addi %0, %arg1 : i32
    %c0_i32 = arith.constant 0 : i32
    %2 = arith.minsi %1, %c0_i32 : i32
    %c0_i32_0 = arith.constant 0 : i32
    %c0_i32_1 = arith.constant 0 : i32
    %c0_i32_2 = arith.constant 0 : i32
    return %2, %c0_i32_0, %c0_i32_1 : i32, i32, i32
  }
  func.func @transform_1(%arg0: i32, %arg1: i32) -> (i32, i32, i32) {
    %c0_i32 = arith.constant 0 : i32
    %c0_i32_0 = arith.constant 0 : i32
    %c0_i32_1 = arith.constant 0 : i32
    return %arg0, %c0_i32, %c0_i32_0 : i32, i32, i32
  }
}

</mosaic_0001>

<bundles_post_ra>
// kernel: tpu_custom_call.1
= control target key start
LH: loop header
LB: loop body
LE: loop exit
PB: predicated region body
PF: predicated region fallthrough
CT: control target
= control target key end

     0   :  { %6 = vsyncpa [#allocation4], 0  ;;  %s268_s0 = inlined_call_operand.hbm [shape: f32[2,8,32], index: 0, kind: input, shape index: {}]   ;;  %s269_s1 = inlined_call_operand.hbm [shape: f32[1,8,128], index: 1, kind: output, shape index: {}]  }
   0x1   :  { %7 = vsyncpa [#allocation5], 0  ;;  %s18_s8 = sshll.u32 %s268_s0, 4  ;;  %s237_s9 = smov [#allocation3]   ;;  %s19_s8 = int_to_ptr.hbm [resolvable:$true] %s18_s8 }
   0x2   :  { %s20_s10 = sshll.u32 %s237_s9, 4  ;;  %s238_s11 = smov 128   ;;  %s21_s10 = int_to_ptr.vmem [resolvable:$true] %s20_s10 }
   0x3   :  { %s239_s12 = smov 8  }
   0x4   :  { %26 = dma.hbm_to_vmem [thread:$0]  %s19_s8, 256, %s21_s10, [#allocation4], %s238_s11, %s238_s11, %s239_s12  }
   0x5   :  { %233 = dma.done.wait [#allocation4], 256  }
   0x6   :  { %234 = vsyncadd [#allocation4], 4294967040  ;;  %vm45_vm0 = vcmask 261120   ;;  %v42_v0 = vld [vmem:[#allocation3 + $0x8] sm:$0xff]  ;;  %v41_v1 = vld [vmem:[#allocation3] sm:$0xff]  ;;  %v96_v4 = vlaneseq  ;;  %vm39_vm1 = vcmask 58368  }
   0x7   :  { %v71_v2 = vrot.slane %v42_v0, 7  ;;  %176 = vmatpush.xpose.msk.msra.mxu1 %vm45_vm0, %v42_v0  ;;  %v44_v3 = vrot.slane %v41_v1, 7  ;;  %174 = vmatpush.xpose.msk.msra.mxu0 %vm45_vm0, %v41_v1  ;;  %v240_v6 = vmov 0.0   ;;  %vm109_vm5 = vcmask 1041409   ;;  %s241_s0 = smov [#allocation6]   ;;  %s162_s16 = sshll.u32 %s269_s1, 4  ;;  %s163_s16 = int_to_ptr.hbm [resolvable:$true] %s162_s16 }
   0x8   :  { %v99_v5 = vshrl.u32 %v96_v4, 7  ;;  %40 = vst.msk [vmem:[#allocation2] sm:$0x3] %vm39_vm1, %v240_v6  ;;  %v97_v7 = vand.u32 127, %v96_v4  ;;  %s160_s13 = sshll.u32 %s241_s0, 4  ;;  %s161_s13 = int_to_ptr.vmem [resolvable:$true] %s160_s13 }
   0xa   :  { %177 = vmatmul.msk.f32.vlgmr.msra.gmra.mxu1 %vm45_vm0, %v71_v2  ;;  %175 = vmatmul.msk.f32.vlgmr.msra.gmra.mxu0 %vm45_vm0, %v44_v3  ;;  %vm104_vm2 = vcmp.lt.s32.totalorder %v99_v5, 2  ;;  %vm127_vm3 = vcmp.lt.s32.totalorder %v97_v7, 6  ;;  %vm105_vm6 = vcmp.eq.s32.totalorder %v97_v7, 6 }
   0xb   :  { %vm256_vm4 = vmand %vm127_vm3, %vm104_vm2 }
   0xf   :  { %v135_v22 = vld [vmem:[#allocation2] sm:$0x3] }
  0x87   :  { %v93_v9 = vpop.f32.mrf.mxu1  ;;  %v67_v10 = vpop.f32.mrf.mxu0 }
  0x88   :  { %v108_v11 = vrot.slane %v93_v9, 7 }
  0x8a   :  { %v110_v12 = vsel %vm109_vm5, %v108_v11, %v67_v10 }
  0x8b   :  { %v112_v13 = vsel %vm105_vm6, %v110_v12, 0.0 }
  0x8c   :  { %v114_v14 = vsel %vm39_vm1, %v112_v13, 0.0 }
  0x8d   :  { %115 = vadd.xlane.f32.xlu0 %v114_v14 }
 0x100   :  { %v116_v15 = vpop.xlane.xlu0 %115 }
 0x101   :  { %v120_v16 = vrot.slane %v116_v15, 1  ;;  %v123_v17 = vsub.f32 %v67_v10, %v116_v15 }
 0x103   :  { %v124_v18 = vsub.f32 %v93_v9, %v120_v16  ;;  %v125_v20 = vmax.f32 %v123_v17, 0.0 }
 0x105   :  { %v126_v19 = vmax.f32 %v124_v18, 0.0 }
 0x107   :  { %v131_v21 = vrot.slane %v126_v19, 7 }
 0x109   :  { %v132_v23 = vsel %vm109_vm5, %v131_v21, %v125_v20 }
 0x10a   :  { %v134_v24 = vsel %vm256_vm4, %v132_v23, 0.0 }
 0x10b   :  { %v136_v25 = vadd.f32 %v135_v22, %v134_v24 }
 0x10d   :  { %137 = vst.msk [vmem:[#allocation2] sm:$0x3] %vm39_vm1, %v136_v25 }
 0x114   :  { %v141_v26 = vld [vmem:[#allocation2] sm:$0x3] }
 0x115   :  { %v142_v27 = vsel %vm39_vm1, %v141_v26, 0.0 }
 0x116   :  { %143 = vadd.xlane.f32.xlu0 %v142_v27 }
 0x189   :  { %v144_v28 = vpop.xlane.xlu0 %143 }
 0x18a   :  { %v145_v29 = vrot.slane %v144_v28, 4 }
 0x18c   :  { %v146_v30 = vadd.f32 %v145_v29, %v144_v28 }
 0x18e   :  { %v147_v31 = vrot.slane %v146_v30, 2 }
 0x190   :  { %v148_v32 = vadd.f32 %v147_v31, %v146_v30 }
 0x192   :  { %v149_v33 = vrot.slane %v148_v32, 1 }
 0x194   :  { %v150_v34 = vadd.f32 %v149_v33, %v148_v32 }
 0x196   :  { %178 = vpush %v150_v34 }
 0x1c7   :  { %s179_s17 = spop %178 }
 0x1c8   :  { %s152_s18 = smul.f32 0.083333336, %s179_s17 }
 0x1ca   :  { %v153_v35 = vstv %s152_s18 }
 0x1cb   :  { %154 = vst [vmem:[#allocation6] sm:$0xff] %v153_v35 }
 0x1cc   :  { %165 = dma.vmem_to_hbm [thread:$0]  %s161_s13, 128, %s163_s16, [#allocation5]  }
 0x1cd   :  { %235 = dma.done.wait [#allocation5], 128  }
 0x1ce   :  { %236 = vsyncadd [#allocation5], 4294967168 }
 0x1cf   :  { %170 = vsyncpa [#allocation4], 1 }
 0x1d0   :  { %171 = vsyncpa [#allocation5], 1 }

</bundles_post_ra>
